<compile_context>
chip_gen: v5e
topology: v5e:2x2
jax: 0.10.0
libtpu: 0.0.40
codegen_flags: <defaults>
</compile_context>

<pallas_src>
import functools

import jax
import jax.numpy as jnp
from jax.experimental import pallas as pl
from jax.experimental.pallas import tpu as pltpu

_LANE = 128
_MIB = 1024 * 1024
_MAX_LANES_PER_STEP = 8192          # raised from 2048 per perf review


def _vmem_capacity_bytes():
    """Physical VMEM of the current TPU generation (fallback: v7x's 64 MiB)."""
    try:
        return int(pltpu.get_tpu_info().vmem_capacity_bytes)
    except Exception:
        return 64 * _MIB


def _round_up(x, m):
    return (x + m - 1) // m * m


def _largest_divisor_leq(n, cap):
    """Largest divisor of n that is <= cap (keeps batch blocks full-size)."""
    cap = max(1, min(int(cap), int(n)))
    for d in range(cap, 0, -1):
        if n % d == 0:
            return d
    return 1


def _conv1x1_kernel(x_ref, w_ref, b_ref, o_ref, *, nb):
    # x_ref: (nb, Cin, t)   nb batch elements, one lane-tile of H*W
    # w_ref: (Cout, Cin)    1x1 conv weight (kernel dims squeezed), VMEM resident
    # b_ref: (Cout, 1)      bias column (f32), broadcast along lanes
    # o_ref: (nb, Cout, t)  lane-dense output tile
    w = w_ref[...]
    b = b_ref[...]
    for i in range(nb):  # nb is small & static -> unrolled; each dot hits the MXU
        acc = jnp.dot(w, x_ref[i], preferred_element_type=jnp.float32)
        o_ref[i] = (acc + b).astype(o_ref.dtype)


def _pick_tiling(n, cin, cout, hw, in_item, out_item, vmem_limit, max_lanes_cap):
    """Choose (nb, t_hw): batch block and H*W lane tile per grid step."""
    per_lane = 2 * (cin * in_item + cout * out_item)    # dbl-buffered x-in + out
    fixed = 2 * (cout * cin * in_item + cout * 4)       # resident weight + bias
    margin = 2 * _MIB                                   # compiler scratch headroom
    tile_budget = max(vmem_limit - fixed - margin, per_lane * _LANE)
    max_lanes = min(int(tile_budget // per_lane), int(max_lanes_cap))
    max_lanes = max((max_lanes // _LANE) * _LANE, _LANE)

    if hw > max_lanes:
        # Large feature maps: one image per step, tile H*W (multiple of 128;
        # the ragged final tile is masked by Pallas).
        nb, t_hw = 1, max_lanes
    else:
        # Small feature maps: pack several images per step to amortize the
        # ~0.35 us fixed per-grid-step overhead.
        nb = _largest_divisor_leq(n, max(1, max_lanes // max(hw, 1)))
        t_hw = hw

    n_nb = pl.cdiv(n, nb)
    n_hw = pl.cdiv(hw, t_hw)
    # v7x has 2 TensorCores: make sure the (parallel) grid has >= 2 blocks
    # whenever the problem is splittable, otherwise one core idles.
    if n_nb * n_hw == 1:
        if hw >= 2 * _LANE:
            t_hw = _round_up(-(-hw // 2), _LANE)
        elif n >= 2:
            nb = _largest_divisor_leq(n, max(1, n // 2))
    return nb, t_hw


def conv1x1_pallas(x_nchw, weight, bias, *, compute_dtype=None, out_dtype=None,
                   pad_hw=False, max_lanes_per_step=_MAX_LANES_PER_STEP):
    """LandmarkHead_stitch.forward: 1x1 conv, stride 1, no padding, NCHW.

    x_nchw: (N, Cin, H, W); weight: (Cout, Cin) (1x1 kernel squeezed);
    bias: (Cout,).  Returns (N, Cout, H, W) in `out_dtype` (default: x dtype).

    compute_dtype: optionally jnp.bfloat16 to halve HBM read traffic
      (f32 accumulate + f32 bias add); default keeps x's dtype for exact
      parity with the PyTorch module.
    pad_hw: zero-pad H*W up to a multiple of 128 so every store is unmasked.
      Off by default: pad/slice are extra full HBM passes that usually cost
      more than the masked tail stores they remove.
    """
    N, Cin, H, W = x_nchw.shape
    Cout = weight.shape[0]
    HW = H * W

    out_dtype = x_nchw.dtype if out_dtype is None else out_dtype
    compute_dtype = x_nchw.dtype if compute_dtype is None else compute_dtype

    x3 = x_nchw.reshape(N, Cin, HW).astype(compute_dtype)   # reshape = view
    w2 = weight.astype(compute_dtype)
    b2 = bias.astype(jnp.float32).reshape(Cout, 1)

    hw_pad = HW
    if pad_hw and HW % _LANE != 0:
        hw_pad = _round_up(HW, _LANE)
        x3 = jnp.pad(x3, ((0, 0), (0, 0), (0, hw_pad - HW)))

    # Generation-aware scoped-VMEM limit: v7x (64 MiB physical) -> ~48 MiB,
    # v5e/v6e (128 MiB physical) -> ~96 MiB.  Tile sizing uses this budget.
    cap = _vmem_capacity_bytes()
    vmem_limit = int(max(min(cap - 16 * _MIB, 96 * _MIB), 16 * _MIB))

    in_item = jnp.dtype(compute_dtype).itemsize
    out_item = jnp.dtype(out_dtype).itemsize
    nb, t_hw = _pick_tiling(N, Cin, Cout, hw_pad, in_item, out_item,
                            vmem_limit, max_lanes_per_step)
    grid = (pl.cdiv(N, nb), pl.cdiv(hw_pad, t_hw))

    kernel = functools.partial(_conv1x1_kernel, nb=nb)

    # NOTE: weight/bias index_maps are constant, so the pipeline fetches them
    # once and they stay VMEM-resident across all grid steps.
    # TODO(synk): on v7x, sweep pipeline_mode=pl.Buffered(3) on the x/out
    # BlockSpecs if profiles show exposed DMA between the short per-step copies.
    out3 = pl.pallas_call(
        kernel,
        out_shape=jax.ShapeDtypeStruct((N, Cout, hw_pad), out_dtype),
        grid_spec=pltpu.PrefetchScalarGridSpec(
            num_scalar_prefetch=0,
            grid=grid,
            in_specs=[
                pl.BlockSpec((nb, Cin, t_hw), lambda i, j: (i, 0, j)),
                pl.BlockSpec((Cout, Cin), lambda i, j: (0, 0)),
                pl.BlockSpec((Cout, 1), lambda i, j: (0, 0)),
            ],
            out_specs=pl.BlockSpec((nb, Cout, t_hw), lambda i, j: (i, 0, j)),
        ),
        compiler_params=pltpu.CompilerParams(
            dimension_semantics=("parallel", "parallel"),
            vmem_limit_bytes=vmem_limit,
        ),
    )(x3, w2, b2)

    if hw_pad != HW:
        out3 = out3[:, :, :HW]
    return out3.reshape(N, Cout, H, W)


def _reference(x, weight, bias):
    return jnp.einsum("nchw,oc->nohw", x, weight) + bias[None, :, None, None]


def _init_params(key, cin, cout, dtype=jnp.float32):
    # PyTorch Conv2d default init: uniform(-1/sqrt(fan_in), 1/sqrt(fan_in))
    kw, kb = jax.random.split(key)
    bound = 1.0 / (cin ** 0.5)   # 1x1 kernel -> fan_in = cin
    w = jax.random.uniform(kw, (cout, cin), minval=-bound, maxval=bound, dtype=dtype)
    b = jax.random.uniform(kb, (cout,), minval=-bound, maxval=bound, dtype=dtype)
    return w, b


if __name__ == "__main__":
    key = jax.random.PRNGKey(0)
    keys = jax.random.split(key, 6)

    # Test 1: module-consistent small shapes (inchannels 512 scaled down to 128).
    # Exercises the batch-packing path + the >=2-block megacore split.
    N, C, H, Wd = 2, 128, 16, 16
    x = jax.random.normal(keys[0], (N, C, H, Wd), dtype=jnp.float32)
    w, b = _init_params(keys[1], C, C)
    out = jax.block_until_ready(conv1x1_pallas(x, w, b))
    ref = _reference(x, w, b)
    assert out.shape == (N, C, H, Wd)
    assert jnp.allclose(out, ref, atol=1e-4, rtol=1e-4)

    # Test 2: H*W larger than the lane tile (cap forced to 1024 so small shapes
    # exercise the multi-tile grid + masked ragged tail path).
    N2, C2, H2, W2 = 1, 8, 48, 48
    x2 = jax.random.normal(keys[2], (N2, C2, H2, W2), dtype=jnp.float32)
    w2, b2 = _init_params(keys[3], C2, C2)
    out2 = jax.block_until_ready(
        conv1x1_pallas(x2, w2, b2, max_lanes_per_step=1024))
    ref2 = _reference(x2, w2, b2)
    assert jnp.allclose(out2, ref2, atol=1e-4, rtol=1e-4)

    # Test 3: non-128-aligned H*W (20x20=400): default masked-tail path and the
    # optional padded path must both match.
    N3, C3, H3, W3 = 2, 16, 20, 20
    x3 = jax.random.normal(keys[4], (N3, C3, H3, W3), dtype=jnp.float32)
    w3, b3 = _init_params(keys[5], C3, C3)
    ref3 = _reference(x3, w3, b3)
    out3a = jax.block_until_ready(conv1x1_pallas(x3, w3, b3))
    out3b = jax.block_until_ready(conv1x1_pallas(x3, w3, b3, pad_hw=True))
    assert jnp.allclose(out3a, ref3, atol=1e-4, rtol=1e-4)
    assert jnp.allclose(out3b, ref3, atol=1e-4, rtol=1e-4)

    # Test 4: optional bf16 compute (f32 accumulate) — halves HBM read traffic.
    out4 = jax.block_until_ready(
        conv1x1_pallas(x, w, b, compute_dtype=jnp.bfloat16))
    ref4 = _reference(x.astype(jnp.bfloat16).astype(jnp.float32),
                      w.astype(jnp.bfloat16).astype(jnp.float32), b)
    assert jnp.allclose(out4, ref4, atol=2e-3, rtol=2e-3)

    print("KERNEL_OK")
</pallas_src>

<mosaic_0001>
module attributes {stable_mosaic.version = 11 : i64} {
  func.func @_conv1x1_kernel(%arg0: i32, %arg1: i32, %arg2: memref<2x128x128xf32, #tpu.memory_space<vmem>>, %arg3: memref<128x128xf32, #tpu.memory_space<vmem>>, %arg4: memref<128x1xf32, #tpu.memory_space<vmem>>, %arg5: memref<2x128x128xf32, #tpu.memory_space<vmem>>) attributes {dimension_semantics = [#tpu.dimension_semantics<parallel>, #tpu.dimension_semantics<parallel>], iteration_bounds = array<i64: 1, 2>, scalar_prefetch = 0 : i64, scratch_operands = 0 : i64, tpu.core_type = #tpu.core_type<tc>, window_params = [{transform_indices = @transform_0, window_bounds = array<i64: 2, 128, 128>}, {pipeline_mode = #tpu.pipeline_mode<synchronous>, transform_indices = @transform_1, window_bounds = array<i64: 128, 128>}, {pipeline_mode = #tpu.pipeline_mode<synchronous>, transform_indices = @transform_2, window_bounds = array<i64: 128, 1>}, {transform_indices = @transform_3, window_bounds = array<i64: 2, 128, 128>}]} {
    %c0 = arith.constant 0 : index
    %c0_0 = arith.constant 0 : index
    %0 = vector.load %arg3[%c0, %c0_0] : memref<128x128xf32, #tpu.memory_space<vmem>>, vector<128x128xf32>
    %c0_1 = arith.constant 0 : index
    %c0_2 = arith.constant 0 : index
    %1 = vector.load %arg4[%c0_1, %c0_2] : memref<128x1xf32, #tpu.memory_space<vmem>>, vector<128x1xf32>
    %c0_3 = arith.constant 0 : index
    %c0_4 = arith.constant 0 : index
    %c0_5 = arith.constant 0 : index
    %2 = vector.load %arg2[%c0_3, %c0_4, %c0_5] : memref<2x128x128xf32, #tpu.memory_space<vmem>>, vector<1x128x128xf32>
    %3 = vector.shape_cast %2 : vector<1x128x128xf32> to vector<128x128xf32>
    %cst = arith.constant dense<0.000000e+00> : vector<128x128xf32>
    %4 = tpu.matmul %0, %3, %cst {dimension_numbers = #tpu.dot_dimension_numbers<[1], [0], [0], [1], [0, 0, 1, 1], [], []>} : vector<128x128xf32>, vector<128x128xf32>, vector<128x128xf32> -> vector<128x128xf32>
    %5 = vector.broadcast %1 : vector<128x1xf32> to vector<128x128xf32>
    %6 = arith.addf %4, %5 : vector<128x128xf32>
    %c0_6 = arith.constant 0 : index
    %c0_7 = arith.constant 0 : index
    %c0_8 = arith.constant 0 : index
    %7 = vector.load %arg5[%c0_6, %c0_7, %c0_8] : memref<2x128x128xf32, #tpu.memory_space<vmem>>, vector<1x128x128xf32>
    %8 = vector.shape_cast %7 : vector<1x128x128xf32> to vector<128x128xf32>
    %9 = vector.shape_cast %6 : vector<128x128xf32> to vector<1x128x128xf32>
    tpu.vector_store %arg5[%c0_6, %c0_7, %c0_8], %9 {strides = array<i32>} : memref<2x128x128xf32, #tpu.memory_space<vmem>>, vector<1x128x128xf32>,
    %c1 = arith.constant 1 : index
    %c0_9 = arith.constant 0 : index
    %c0_10 = arith.constant 0 : index
    %10 = vector.load %arg2[%c1, %c0_9, %c0_10] : memref<2x128x128xf32, #tpu.memory_space<vmem>>, vector<1x128x128xf32>
    %11 = vector.shape_cast %10 : vector<1x128x128xf32> to vector<128x128xf32>
    %cst_11 = arith.constant dense<0.000000e+00> : vector<128x128xf32>
    %12 = tpu.matmul %0, %11, %cst_11 {dimension_numbers = #tpu.dot_dimension_numbers<[1], [0], [0], [1], [0, 0, 1, 1], [], []>} : vector<128x128xf32>, vector<128x128xf32>, vector<128x128xf32> -> vector<128x128xf32>
    %13 = vector.broadcast %1 : vector<128x1xf32> to vector<128x128xf32>
    %14 = arith.addf %12, %13 : vector<128x128xf32>
    %c1_12 = arith.constant 1 : index
    %c0_13 = arith.constant 0 : index
    %c0_14 = arith.constant 0 : index
    %15 = vector.load %arg5[%c1_12, %c0_13, %c0_14] : memref<2x128x128xf32, #tpu.memory_space<vmem>>, vector<1x128x128xf32>
    %16 = vector.shape_cast %15 : vector<1x128x128xf32> to vector<128x128xf32>
    %17 = vector.shape_cast %14 : vector<128x128xf32> to vector<1x128x128xf32>
    tpu.vector_store %arg5[%c1_12, %c0_13, %c0_14], %17 {strides = array<i32>} : memref<2x128x128xf32, #tpu.memory_space<vmem>>, vector<1x128x128xf32>,
    return
  }
  func.func @transform_0(%arg0: i32, %arg1: i32) -> (i32, i32, i32) {
    %c0_i32 = arith.constant 0 : i32
    %c0_i32_0 = arith.constant 0 : i32
    return %arg0, %c0_i32, %arg1 : i32, i32, i32
  }
  func.func @transform_1(%arg0: i32, %arg1: i32) -> (i32, i32) {
    %c0_i32 = arith.constant 0 : i32
    %c0_i32_0 = arith.constant 0 : i32
    %c0_i32_1 = arith.constant 0 : i32
    return %c0_i32, %c0_i32_0 : i32, i32
  }
  func.func @transform_2(%arg0: i32, %arg1: i32) -> (i32, i32) {
    %c0_i32 = arith.constant 0 : i32
    %c0_i32_0 = arith.constant 0 : i32
    %c0_i32_1 = arith.constant 0 : i32
    return %c0_i32, %c0_i32_0 : i32, i32
  }
  func.func @transform_3(%arg0: i32, %arg1: i32) -> (i32, i32, i32) {
    %c0_i32 = arith.constant 0 : i32
    %c0_i32_0 = arith.constant 0 : i32
    return %arg0, %c0_i32, %arg1 : i32, i32, i32
  }
}

</mosaic_0001>

<bundles_post_ra>
// kernel: tpu_custom_call.1
= control target key start
LH: loop header
LB: loop body
LE: loop exit
PB: predicated region body
PF: predicated region fallthrough
CT: control target
= control target key end

     0   :  { %8 = vsyncpa [#allocation3], 0  ;;  %s1213_s0 = inlined_call_operand.hbm [shape: f32[2,128,256], index: 0, kind: input, shape index: {}]   ;;  %s1214_s1 = inlined_call_operand.vmem [shape: f32[128,128], index: 1, kind: input, shape index: {}]   ;;  %s1215_s2 = inlined_call_operand.vmem [shape: f32[128,1], index: 2, kind: input, shape index: {}]   ;;  %s1216_s3 = inlined_call_operand.hbm [shape: f32[2,128,256], index: 3, kind: output, shape index: {}]  }
   0x1   :  { %10 = vsyncpa [#allocation3 + $0x1], 0 }
   0x2   :  { %11 = vsyncpa [#allocation4], 0 }
   0x3   :  { %13 = vsyncpa [#allocation4 + $0x1], 0  ;;  %s912_s12 = smov 0   ;;  %s914_s13 = smov 0  }
   0x4   :  { %s916_s14 = smov 0   ;;  %s918_s15 = smov 0  }
   0x5   :  { %s920_s16 = smov 0   ;;  %s922_s17 = smov 0  }
   0x6 LB: > { %s622_s18 = sadd.s32 4294967295, %s883_s17   ;;  %s623_s19 = sadd.s32 4294967294, %s883_s17   ;;  %s883_s17 = sphi %s922_s17, %s19_s17   ;;  %s879_s16 = sphi %s920_s16, %s1225_s16   ;;  %s875_s15 = sphi %s918_s15, %s1224_s15   ;;  %s871_s14 = sphi %s916_s14, %s1223_s14   ;;  %s867_s13 = sphi %s914_s13, %s1222_s13   ;;  %s863_s12 = sphi %s912_s12, %s1221_s12  }
   0x7   : > { %s28_s20 = sadd.s32 1, %s879_s16  ;;  %s40_s21 = sadd.s32 1, %s871_s14 }
   0x8   : > { %p29_p0 = scmp.ge.s32.totalorder %s28_s20, 2  ;;  %p47_p1 = scmp.ne.s32.totalorder %s871_s14, %s867_s13 }
   0x9   : > { %p48_p2 = scmp.eq.s32.totalorder %s883_s17, 0  ;;  %p53_p3 = scmp.ne.s32.totalorder %s867_s13, %s863_s12 }
   0xa   : > { %s1227_s20 = smov (%p29_p0, %s28_s20), 0  ;;  %p54_p5 = scmp.eq.s32.totalorder %s622_s18, 0 }
   0xb   : > { %p953_p4 = por %p48_p2, %p47_p1  ;;  %s36_s23 = ssub.s32 %s879_s16, %s1227_s20 }
   0xc   : > { %p121_p6 = scmp.eq.s32.totalorder %s622_s18, 1  ;;  %p38_p7 = scmp.eq.s32.totalorder %s36_s23, 0 }
   0xd   : > { %p959_p8 = por %p54_p5, %p53_p3  ;;  %p127_p10 = scmp.eq.s32.totalorder %s623_s19, 1 }
   0xe   : > { %p963_p9 = por %p121_p6, %p47_p1  ;;  %p625_p12 = scmp.ge.s32.totalorder %s883_s17, 2 }
   0xf   : > { %s968_s26 = scalar_select %p38_p7, %s871_s14, %s40_s21  }
  0x10   : > { %p970_p11 = por %p127_p10, %p53_p3  ;;  %p711_p13 = scmp.lt.s32.totalorder %s883_s17, 2 }
  0x11   : > { %s153_s28 = sand.u32 1, %s871_s14   ;;  %s627_s30 = sshll.u32 %s879_s16, 3 }
  0x12   : > { %s626_s29 = sshll.u32 %s153_s28, 8  ;;  %s164_s6 = scalar_lea.hbm %s1213_s0, %s627_s30 }
  0x13   : > { %s157_s7 = scalar_lea.vmem [#allocation2], %s626_s29  ;;  %s165_s9 = sshll.u32 %s164_s6, 4  ;;  %s166_s9 = int_to_ptr.hbm [resolvable:$true] %s165_s9 }
  0x14   : > { %s167_s8 = sshll.u32 %s157_s7, 4  ;;  %p704_p0 = pnand %p711_p13, %p953_p4  ;;  %s168_s8 = int_to_ptr.vmem [resolvable:$true] %s167_s8 }
  0x15   : > { %s154_s10 = scalar_lea.sflag [#allocation3], %s153_s28  ;;  %s885_s11 = smov 256  }
  0x16   : > { %s886_s18 = smov 128   ;;  %s887_s19 = smov 8  }
  0x17   : > { %706 = dma.hbm_to_vmem [thread:$0]  (!%p704_p0), %s166_s9, 4096, %s168_s8, %s154_s10, %s885_s11, %s886_s18, %s887_s19  }
  0x18   : > { %p628_p1 = scmp.ge.s32.totalorder %s883_s17, 1  ;;  %p175_p2 = scmp.lt.s32.totalorder %s883_s17, 3 }
  0x1a   : > { %p176_p3 = pnand %p628_p1, %p175_p2 }
  0x1b   : > { %s986_s21 = sand.u32 (!%p176_p3), 1, %s867_s13  }
  0x1c   : > { %179 = sbr.rel (%p176_p3) target bundleno = 265 (0x109), region = 32  ;;  %s629_s23 = sshll.u32 (!%p176_p3), %s986_s21, 8 }
  0x1d   : > { %s182_s29 = scalar_lea.sflag (!%p176_p3), [#allocation3], %s986_s21  ;;  %s992_s22 = scalar_lea.vmem (!%p176_p3), [#allocation2], %s629_s23 }
  0x21   : > { %854 = dma.done.wait (%p959_p8), %s182_s29, 4096  }
  0x22   : > { %856 = vsyncadd (%p959_p8), %s182_s29, 4294963200  ;;  %v888_v0 = vmov 0   ;;  %v258_v1 = vld [vmem:[%s992_s22 + $0x78] sm:$0xff]  ;;  %v257_v3 = vld [vmem:[%s992_s22 + $0x70] sm:$0xff]  ;;  %s1130_s5 = scalar_lea.vmem [#allocation5], %s629_s23  ;;  %s664_s23 = sshll.u32 %s875_s15, 3 }
  0x23   : > { %768 = vset.pattern.permute.xlu0 %v888_v0  ;;  %769 = vset.pattern.permute.xlu1 %v888_v0  ;;  %v646_v2 = vld [vmem:[%s992_s22 + $0xf8] sm:$0xff]  ;;  %v645_v4 = vld [vmem:[%s992_s22 + $0xf0] sm:$0xff]  ;;  %v256_v5 = vld [vmem:[%s992_s22 + $0x68] sm:$0xff]  ;;  %s533_s8 = scalar_lea.hbm %s1216_s3, %s664_s23  ;;  %s534_s15 = sshll.u32 %s1130_s5, 4  ;;  %s535_s15 = int_to_ptr.vmem [resolvable:$true] %s534_s15 }
  0x24   : > { %770 = vset.pattern.permute.xlu2 %v888_v0  ;;  %339 = vmatpush.msra.mxu0 %v258_v1  ;;  %v644_v6 = vld [vmem:[%s992_s22 + $0xe8] sm:$0xff]  ;;  %v255_v7 = vld [vmem:[%s992_s22 + $0x60] sm:$0xff]  ;;  %v254_v9 = vld [vmem:[%s992_s22 + $0x58] sm:$0xff]  ;;  %s536_s9 = sshll.u32 %s533_s8, 4  ;;  %s520_s10 = scalar_lea.sflag [#allocation4], %s986_s21  ;;  %s537_s9 = int_to_ptr.hbm [resolvable:$true] %s536_s9 }
  0x25   : > { %667 = vmatpush.msra.mxu2 %v258_v1  ;;  %437 = vmatpush.msra.mxu1 %v646_v2  ;;  %v643_v8 = vld [vmem:[%s992_s22 + $0xe0] sm:$0xff]  ;;  %v642_v10 = vld [vmem:[%s992_s22 + $0xd8] sm:$0xff]  ;;  %v253_v11 = vld [vmem:[%s992_s22 + $0x50] sm:$0xff]  ;;  %s815_s11 = sshra.s32 %s537_s9, 4  ;;  %s816_s11 = int_to_ptr.hbm [resolvable:$true] %s815_s11 }
  0x26   : > { %683 = vmatpush.msra.mxu3 %v646_v2  ;;  %340 = vmatpush.msra.mxu0 %v257_v3  ;;  %v641_v12 = vld [vmem:[%s992_s22 + $0xd0] sm:$0xff]  ;;  %v252_v13 = vld [vmem:[%s992_s22 + $0x48] sm:$0xff]  ;;  %v251_v15 = vld [vmem:[%s992_s22 + $0x40] sm:$0xff]  ;;  %s817_s18 = scalar_lea.hbm %s816_s11, 256  ;;  %p822_p7 = scmp.lt.s32.totalorder %s816_s11, %s1216_s3 }
  0x27   : > { %668 = vmatpush.msra.mxu2 %v257_v3  ;;  %438 = vmatpush.msra.mxu1 %v645_v4  ;;  %v640_v14 = vld [vmem:[%s992_s22 + $0xc8] sm:$0xff]  ;;  %v639_v16 = vld [vmem:[%s992_s22 + $0xc0] sm:$0xff]  ;;  %v250_v17 = vld [vmem:[%s992_s22 + $0x38] sm:$0xff]  ;;  %p818_p4 = scmp.ne.s32.totalorder %s816_s11, %s817_s18 }
  0x28   : > { %684 = vmatpush.msra.mxu3 %v645_v4  ;;  %341 = vmatpush.msra.mxu0 %v256_v5  ;;  %v638_v18 = vld [vmem:[%s992_s22 + $0xb8] sm:$0xff]  ;;  %v249_v19 = vld [vmem:[%s992_s22 + $0x30] sm:$0xff]  ;;  %v248_v21 = vld [vmem:[%s992_s22 + $0x28] sm:$0xff] }
  0x29   : > { %669 = vmatpush.msra.mxu2 %v256_v5  ;;  %439 = vmatpush.msra.mxu1 %v644_v6  ;;  %v637_v20 = vld [vmem:[%s992_s22 + $0xb0] sm:$0xff]  ;;  %v636_v22 = vld [vmem:[%s992_s22 + $0xa8] sm:$0xff]  ;;  %v247_v23 = vld [vmem:[%s992_s22 + $0x20] sm:$0xff]  ;;  %p819_p5 = pnand %p818_p4, %p963_p9 }
  0x2a   : > { %685 = vmatpush.msra.mxu3 %v644_v6  ;;  %342 = vmatpush.msra.mxu0 %v255_v7  ;;  %v635_v24 = vld [vmem:[%s992_s22 + $0xa0] sm:$0xff]  ;;  %v246_v25 = vld [vmem:[%s992_s22 + $0x18] sm:$0xff]  ;;  %v245_v28 = vld [vmem:[%s992_s22 + $0x10] sm:$0xff] }
  0x2b   : > { %670 = vmatpush.msra.mxu2 %v255_v7  ;;  %440 = vmatpush.msra.mxu1 %v643_v8  ;;  %v634_v26 = vld [vmem:[%s992_s22 + $0x98] sm:$0xff]  ;;  %v227_v27 = vld [vmem:[%s1215_s2] sm:$0xff]  ;;  %v633_v29 = vld [vmem:[%s992_s22 + $0x90] sm:$0xff]  ;;  %p820_p6 = pneg %p819_p5 }
  0x2c   : > { %686 = vmatpush.msra.mxu3 %v643_v8  ;;  %343 = vmatpush.msra.mxu0 %v254_v9  ;;  %v244_v30 = vld [vmem:[%s992_s22 + $0x8] sm:$0xff]  ;;  %v243_v32 = vld [vmem:[%s992_s22] sm:$0xff]  ;;  %v229_v37 = vld [vmem:[%s1215_s2 + $0x10] sm:$0xff] }
  0x2d   : > { %671 = vmatpush.msra.mxu2 %v254_v9  ;;  %441 = vmatpush.msra.mxu1 %v642_v10  ;;  %v632_v31 = vld [vmem:[%s992_s22 + $0x88] sm:$0xff]  ;;  %v631_v33 = vld [vmem:[%s992_s22 + $0x80] sm:$0xff]  ;;  %v233_v41 = vld [vmem:[%s1215_s2 + $0x30] sm:$0xff]  ;;  %s821_s22 = scalar_lea.hbm %s1216_s3, 512 }
  0x2e   : > { %687 = vmatpush.msra.mxu3 %v642_v10  ;;  %344 = vmatpush.msra.mxu0 %v253_v11  ;;  %v211_v34 = vld [vmem:[%s1214_s1] sm:$0xff]  ;;  %v228_v36 = vld [vmem:[%s1215_s2 + $0x8] sm:$0xff]  ;;  %v230_v42 = vld [vmem:[%s1215_s2 + $0x18] sm:$0xff]  ;;  %p823_p8 = scmp.lt.s32.totalorder %s821_s22, %s817_s18 }
  0x2f   : > { %672 = vmatpush.msra.mxu2 %v253_v11  ;;  %442 = vmatpush.msra.mxu1 %v641_v12  ;;  %v219_v35 = vld [vmem:[%s1214_s1 + $0x40] sm:$0xff]  ;;  %v212_v39 = vld [vmem:[%s1214_s1 + $0x8] sm:$0xff]  ;;  %v213_v44 = vld [vmem:[%s1214_s1 + $0x10] sm:$0xff] }
  0x30   : > { %688 = vmatpush.msra.mxu3 %v641_v12  ;;  %345 = vmatpush.msra.mxu0 %v252_v13  ;;  %v231_v38 = vld [vmem:[%s1215_s2 + $0x20] sm:$0xff]  ;;  %v220_v40 = vld [vmem:[%s1214_s1 + $0x48] sm:$0xff]  ;;  %v221_v45 = vld [vmem:[%s1214_s1 + $0x50] sm:$0xff]  ;;  %p824_p10 = por %p823_p8, %p822_p7 }
  0x31   : > { %673 = vmatpush.msra.mxu2 %v252_v13  ;;  %443 = vmatpush.msra.mxu1 %v640_v14  ;;  %v232_v43 = vld [vmem:[%s1215_s2 + $0x28] sm:$0xff]  ;;  %v234_v47 = vld [vmem:[%s1215_s2 + $0x38] sm:$0xff]  ;;  %v235_v48 = vld [vmem:[%s1215_s2 + $0x40] sm:$0xff] }
  0x32   : > { %689 = vmatpush.msra.mxu3 %v640_v14  ;;  %346 = vmatpush.msra.mxu0 %v251_v15  ;;  %v236_v46 = vld [vmem:[%s1215_s2 + $0x48] sm:$0xff]  ;;  %v214_v49 = vld [vmem:[%s1214_s1 + $0x18] sm:$0xff]  ;;  %v239_v51 = vld [vmem:[%s1215_s2 + $0x60] sm:$0xff]  ;;  %p825_p13 = pnand %p824_p10, %p820_p6 }
  0x33   : > { %674 = vmatpush.msra.mxu2 %v251_v15  ;;  %444 = vmatpush.msra.mxu1 %v639_v16  ;;  %v222_v50 = vld [vmem:[%s1214_s1 + $0x58] sm:$0xff]  ;;  %v237_v52 = vld [vmem:[%s1215_s2 + $0x50] sm:$0xff]  ;;  %v215_v54 = vld [vmem:[%s1214_s1 + $0x20] sm:$0xff] }
  0x34   : > { %690 = vmatpush.msra.mxu3 %v639_v16  ;;  %347 = vmatpush.msra.mxu0 %v250_v17  ;;  %v238_v53 = vld [vmem:[%s1215_s2 + $0x58] sm:$0xff]  ;;  %v223_v55 = vld [vmem:[%s1214_s1 + $0x60] sm:$0xff]  ;;  %v240_v57 = vld [vmem:[%s1215_s2 + $0x68] sm:$0xff] }
  0x35   : > { %675 = vmatpush.msra.mxu2 %v250_v17  ;;  %445 = vmatpush.msra.mxu1 %v638_v18  ;;  %v242_v56 = vld [vmem:[%s1215_s2 + $0x78] sm:$0xff]  ;;  %v241_v58 = vld [vmem:[%s1215_s2 + $0x70] sm:$0xff]  ;;  %v216_v59 = vld [vmem:[%s1214_s1 + $0x28] sm:$0xff] }
  0x36   : > { %691 = vmatpush.msra.mxu3 %v638_v18  ;;  %348 = vmatpush.msra.mxu0 %v249_v19  ;;  %v224_v60 = vld [vmem:[%s1214_s1 + $0x68] sm:$0xff]  ;;  %v217_v61 = vld [vmem:[%s1214_s1 + $0x30] sm:$0xff]  ;;  %v218_v63 = vld [vmem:[%s1214_s1 + $0x38] sm:$0xff] }
  0x37   : > { %676 = vmatpush.msra.mxu2 %v249_v19  ;;  %446 = vmatpush.msra.mxu1 %v637_v20  ;;  %v225_v62 = vld [vmem:[%s1214_s1 + $0x70] sm:$0xff]  ;;  %v226_v0 = vld [vmem:[%s1214_s1 + $0x78] sm:$0xff] }
  0x38   : > { %692 = vmatpush.msra.mxu3 %v637_v20  ;;  %349 = vmatpush.msra.mxu0 %v248_v21 }
  0x39   : > { %677 = vmatpush.msra.mxu2 %v248_v21  ;;  %447 = vmatpush.msra.mxu1 %v636_v22 }
  0x3a   : > { %693 = vmatpush.msra.mxu3 %v636_v22  ;;  %350 = vmatpush.msra.mxu0 %v247_v23 }
  0x3b   : > { %678 = vmatpush.msra.mxu2 %v247_v23  ;;  %448 = vmatpush.msra.mxu1 %v635_v24 }
  0x3c   : > { %694 = vmatpush.msra.mxu3 %v635_v24  ;;  %351 = vmatpush.msra.mxu0 %v246_v25 }
  0x3d   : > { %679 = vmatpush.msra.mxu2 %v246_v25  ;;  %449 = vmatpush.msra.mxu1 %v634_v26 }
  0x3e   : > { %695 = vmatpush.msra.mxu3 %v634_v26  ;;  %261 = vperm.xlu0 %768, %v227_v27  }
  0x3f   : > { %352 = vmatpush.msra.mxu0 %v245_v28  ;;  %680 = vmatpush.msra.mxu2 %v245_v28 }
  0x40   : > { %450 = vmatpush.msra.mxu1 %v633_v29  ;;  %696 = vmatpush.msra.mxu3 %v633_v29 }
  0x41   : > { %353 = vmatpush.msra.mxu0 %v244_v30  ;;  %681 = vmatpush.msra.mxu2 %v244_v30 }
  0x42   : > { %451 = vmatpush.msra.mxu1 %v632_v31  ;;  %697 = vmatpush.msra.mxu3 %v632_v31 }
  0x43   : > { %354 = vmatpush.msra.mxu0 %v243_v32  ;;  %682 = vmatpush.msra.mxu2 %v243_v32 }
  0x44   : > { %452 = vmatpush.msra.mxu1 %v631_v33  ;;  %698 = vmatpush.msra.mxu3 %v631_v33 }
  0x45   : > { %355 = vmatmul.f32.vlgmr.msra.gmra.mxu0 %v211_v34  ;;  %379 = vmatmul.f32.vlgmr.msra.gmra.mxu2 %v219_v35 }
  0x46   : > { %453 = vmatmul.f32.vlgmr.msra.gmra.mxu1 %v211_v34  ;;  %477 = vmatmul.f32.vlgmr.msra.gmra.mxu3 %v219_v35 }
  0x47   : > { %266 = vperm.xlu0 %768, %v228_v36   ;;  %271 = vperm.xlu1 %769, %v229_v37  }
  0x48   : > { %281 = vperm.xlu2 %770, %v231_v38  }
  0x4d   : > { %358 = vmatmul.f32.gmra.mxu0 %v212_v39  ;;  %382 = vmatmul.f32.gmra.mxu2 %v220_v40 }
  0x4e   : > { %456 = vmatmul.f32.gmra.mxu1 %v212_v39  ;;  %480 = vmatmul.f32.gmra.mxu3 %v220_v40 }
  0x4f   : > { %291 = vperm.xlu0 %768, %v233_v41   ;;  %276 = vperm.xlu1 %769, %v230_v42  }
  0x50   : > { %286 = vperm.xlu2 %770, %v232_v43  }
  0x55   : > { %361 = vmatmul.f32.gmra.mxu0 %v213_v44  ;;  %385 = vmatmul.f32.gmra.mxu2 %v221_v45 }
  0x56   : > { %459 = vmatmul.f32.gmra.mxu1 %v213_v44  ;;  %483 = vmatmul.f32.gmra.mxu3 %v221_v45 }
  0x57   : > { %306 = vperm.xlu0 %768, %v236_v46   ;;  %296 = vperm.xlu1 %769, %v234_v47  }
  0x58   : > { %301 = vperm.xlu2 %770, %v235_v48  }
  0x5d   : > { %364 = vmatmul.f32.gmra.mxu0 %v214_v49  ;;  %388 = vmatmul.f32.gmra.mxu2 %v222_v50 }
  0x5e   : > { %462 = vmatmul.f32.gmra.mxu1 %v214_v49  ;;  %486 = vmatmul.f32.gmra.mxu3 %v222_v50 }
  0x5f   : > { %321 = vperm.xlu0 %768, %v239_v51   ;;  %311 = vperm.xlu1 %769, %v237_v52  }
  0x60   : > { %316 = vperm.xlu2 %770, %v238_v53  }
  0x65   : > { %367 = vmatmul.f32.gmra.mxu0 %v215_v54  ;;  %391 = vmatmul.f32.gmra.mxu2 %v223_v55 }
  0x66   : > { %465 = vmatmul.f32.gmra.mxu1 %v215_v54  ;;  %489 = vmatmul.f32.gmra.mxu3 %v223_v55 }
  0x67   : > { %336 = vperm.xlu0 %768, %v242_v56   ;;  %326 = vperm.xlu1 %769, %v240_v57  }
  0x68   : > { %331 = vperm.xlu2 %770, %v241_v58  }
  0x6d   : > { %370 = vmatmul.f32.gmra.mxu0 %v216_v59  ;;  %394 = vmatmul.f32.gmra.mxu2 %v224_v60 }
  0x6e   : > { %468 = vmatmul.f32.gmra.mxu1 %v216_v59  ;;  %492 = vmatmul.f32.gmra.mxu3 %v224_v60 }
  0x75   : > { %373 = vmatmul.f32.gmra.mxu0 %v217_v61  ;;  %397 = vmatmul.f32.gmra.mxu2 %v225_v62 }
  0x76   : > { %471 = vmatmul.f32.gmra.mxu1 %v217_v61  ;;  %495 = vmatmul.f32.gmra.mxu3 %v225_v62 }
  0x7d   : > { %376 = vmatmul.f32.gmra.mxu0 %v218_v63  ;;  %400 = vmatmul.f32.gmra.mxu2 %v226_v0 }
  0x7e   : > { %474 = vmatmul.f32.gmra.mxu1 %v218_v63  ;;  %498 = vmatmul.f32.gmra.mxu3 %v226_v0 }
  0xa2   : > { %v282_v2 = vpop.permute.xlu2 %281 }
  0xaa   : > { %v1126_v5 = vpop.permute.xlu2 %286 }
  0xb0   : > { %v262_v1 = vpop.permute.xlu0 %261 }
  0xb2   : > { %v302_v12 = vpop.permute.xlu2 %301 }
  0xb9   : > { %v272_v3 = vpop.permute.xlu1 %271  ;;  %v267_v4 = vpop.permute.xlu0 %266 }
  0xba   : > { %v317_v40 = vpop.permute.xlu2 %316 }
  0xc1   : > { %v277_v9 = vpop.permute.xlu1 %276  ;;  %v1134_v11 = vpop.permute.xlu0 %291 }
  0xc2   : > { %v356_v6 = vpop.f32.mrf.mxu0 }
  0xc3   : > { %v357_v7 = vadd.f32 %v356_v6, %v262_v1  ;;  %v454_v8 = vpop.f32.mrf.mxu1 }
  0xc4   : > { %v455_v10 = vadd.f32 %v454_v8, %v262_v1 }
  0xc5   : > { %404 = vst [vmem:[%s1130_s5] sm:$0xff] %v357_v7 }
  0xc6   : > { %647 = vst [vmem:[%s1130_s5 + $0x80] sm:$0xff] %v455_v10 }
  0xc8   : > { %v380_v13 = vpop.f32.mrf.mxu2 }
  0xc9   : > { %v381_v14 = vadd.f32 %v380_v13, %v302_v12  ;;  %v478_v15 = vpop.f32.mrf.mxu3  ;;  %v1138_v21 = vpop.permute.xlu1 %296 }
  0xca   : > { %v359_v16 = vpop.f32.mrf.mxu0  ;;  %v479_v17 = vadd.f32 %v478_v15, %v302_v12  ;;  %v307_v22 = vpop.permute.xlu0 %306 }
  0xcb   : > { %v360_v18 = vadd.f32 %v359_v16, %v267_v4  ;;  %v457_v19 = vpop.f32.mrf.mxu1  ;;  %412 = vst [vmem:[%s1130_s5 + $0x40] sm:$0xff] %v381_v14 }
  0xcc   : > { %v458_v20 = vadd.f32 %v457_v19, %v267_v4  ;;  %655 = vst [vmem:[%s1130_s5 + $0xc0] sm:$0xff] %v479_v17 }
  0xcd   : > { %405 = vst [vmem:[%s1130_s5 + $0x8] sm:$0xff] %v360_v18 }
  0xce   : > { %648 = vst [vmem:[%s1130_s5 + $0x88] sm:$0xff] %v458_v20 }
  0xd0   : > { %v383_v23 = vpop.f32.mrf.mxu2 }
  0xd1   : > { %v384_v24 = vadd.f32 %v383_v23, %v307_v22  ;;  %v481_v25 = vpop.f32.mrf.mxu3  ;;  %v312_v31 = vpop.permute.xlu1 %311 }
  0xd2   : > { %v362_v26 = vpop.f32.mrf.mxu0  ;;  %v482_v27 = vadd.f32 %v481_v25, %v307_v22  ;;  %v322_v49 = vpop.permute.xlu0 %321 }
  0xd3   : > { %v363_v28 = vadd.f32 %v362_v26, %v272_v3  ;;  %v460_v29 = vpop.f32.mrf.mxu1  ;;  %413 = vst [vmem:[%s1130_s5 + $0x48] sm:$0xff] %v384_v24 }
  0xd4   : > { %v461_v30 = vadd.f32 %v460_v29, %v272_v3  ;;  %656 = vst [vmem:[%s1130_s5 + $0xc8] sm:$0xff] %v482_v27  ;;  %v332_v3 = vpop.permute.xlu2 %331 }
  0xd5   : > { %406 = vst [vmem:[%s1130_s5 + $0x10] sm:$0xff] %v363_v28 }
  0xd6   : > { %649 = vst [vmem:[%s1130_s5 + $0x90] sm:$0xff] %v461_v30 }
  0xd8   : > { %v386_v32 = vpop.f32.mrf.mxu2 }
  0xd9   : > { %v387_v33 = vadd.f32 %v386_v32, %v312_v31  ;;  %v484_v34 = vpop.f32.mrf.mxu3  ;;  %v327_v58 = vpop.permute.xlu1 %326 }
  0xda   : > { %v365_v35 = vpop.f32.mrf.mxu0  ;;  %v485_v36 = vadd.f32 %v484_v34, %v312_v31  ;;  %v337_v12 = vpop.permute.xlu0 %336 }
  0xdb   : > { %v366_v37 = vadd.f32 %v365_v35, %v277_v9  ;;  %v463_v38 = vpop.f32.mrf.mxu1  ;;  %414 = vst [vmem:[%s1130_s5 + $0x50] sm:$0xff] %v387_v33 }
  0xdc   : > { %v464_v39 = vadd.f32 %v463_v38, %v277_v9  ;;  %657 = vst [vmem:[%s1130_s5 + $0xd0] sm:$0xff] %v485_v36 }
  0xdd   : > { %407 = vst [vmem:[%s1130_s5 + $0x18] sm:$0xff] %v366_v37 }
  0xde   : > { %650 = vst [vmem:[%s1130_s5 + $0x98] sm:$0xff] %v464_v39 }
  0xe0   : > { %v389_v41 = vpop.f32.mrf.mxu2 }
  0xe1   : > { %v390_v42 = vadd.f32 %v389_v41, %v317_v40  ;;  %v487_v43 = vpop.f32.mrf.mxu3 }
  0xe2   : > { %v368_v44 = vpop.f32.mrf.mxu0  ;;  %v488_v45 = vadd.f32 %v487_v43, %v317_v40 }
  0xe3   : > { %v369_v46 = vadd.f32 %v368_v44, %v282_v2  ;;  %v466_v47 = vpop.f32.mrf.mxu1  ;;  %415 = vst [vmem:[%s1130_s5 + $0x58] sm:$0xff] %v390_v42 }
  0xe4   : > { %v467_v48 = vadd.f32 %v466_v47, %v282_v2  ;;  %658 = vst [vmem:[%s1130_s5 + $0xd8] sm:$0xff] %v488_v45 }
  0xe5   : > { %408 = vst [vmem:[%s1130_s5 + $0x20] sm:$0xff] %v369_v46 }
  0xe6   : > { %651 = vst [vmem:[%s1130_s5 + $0xa0] sm:$0xff] %v467_v48 }
  0xe8   : > { %v392_v50 = vpop.f32.mrf.mxu2 }
  0xe9   : > { %v393_v51 = vadd.f32 %v392_v50, %v322_v49  ;;  %v490_v52 = vpop.f32.mrf.mxu3 }
  0xea   : > { %v371_v53 = vpop.f32.mrf.mxu0  ;;  %v491_v54 = vadd.f32 %v490_v52, %v322_v49 }
  0xeb   : > { %v372_v55 = vadd.f32 %v371_v53, %v1126_v5  ;;  %v469_v56 = vpop.f32.mrf.mxu1  ;;  %416 = vst [vmem:[%s1130_s5 + $0x60] sm:$0xff] %v393_v51 }
  0xec   : > { %v470_v57 = vadd.f32 %v469_v56, %v1126_v5  ;;  %659 = vst [vmem:[%s1130_s5 + $0xe0] sm:$0xff] %v491_v54 }
  0xed   : > { %409 = vst [vmem:[%s1130_s5 + $0x28] sm:$0xff] %v372_v55 }
  0xee   : > { %652 = vst [vmem:[%s1130_s5 + $0xa8] sm:$0xff] %v470_v57 }
  0xf0   : > { %v395_v59 = vpop.f32.mrf.mxu2 }
  0xf1   : > { %v396_v60 = vadd.f32 %v395_v59, %v327_v58  ;;  %v493_v61 = vpop.f32.mrf.mxu3 }
  0xf2   : > { %v374_v62 = vpop.f32.mrf.mxu0  ;;  %v494_v63 = vadd.f32 %v493_v61, %v327_v58 }
  0xf3   : > { %v375_v0 = vadd.f32 %v374_v62, %v1134_v11  ;;  %v472_v1 = vpop.f32.mrf.mxu1  ;;  %417 = vst [vmem:[%s1130_s5 + $0x68] sm:$0xff] %v396_v60 }
  0xf4   : > { %v473_v2 = vadd.f32 %v472_v1, %v1134_v11  ;;  %660 = vst [vmem:[%s1130_s5 + $0xe8] sm:$0xff] %v494_v63 }
  0xf5   : > { %410 = vst [vmem:[%s1130_s5 + $0x30] sm:$0xff] %v375_v0 }
  0xf6   : > { %653 = vst [vmem:[%s1130_s5 + $0xb0] sm:$0xff] %v473_v2 }
  0xf8   : > { %v398_v4 = vpop.f32.mrf.mxu2 }
  0xf9   : > { %v399_v5 = vadd.f32 %v398_v4, %v332_v3  ;;  %v496_v6 = vpop.f32.mrf.mxu3 }
  0xfa   : > { %v377_v7 = vpop.f32.mrf.mxu0  ;;  %v497_v8 = vadd.f32 %v496_v6, %v332_v3 }
  0xfb   : > { %v378_v9 = vadd.f32 %v377_v7, %v1138_v21  ;;  %v475_v10 = vpop.f32.mrf.mxu1  ;;  %418 = vst [vmem:[%s1130_s5 + $0x70] sm:$0xff] %v399_v5 }
  0xfc   : > { %v476_v11 = vadd.f32 %v475_v10, %v1138_v21  ;;  %661 = vst [vmem:[%s1130_s5 + $0xf0] sm:$0xff] %v497_v8 }
  0xfd   : > { %411 = vst [vmem:[%s1130_s5 + $0x38] sm:$0xff] %v378_v9 }
  0xfe   : > { %654 = vst [vmem:[%s1130_s5 + $0xb8] sm:$0xff] %v476_v11 }
 0x100   : > { %v401_v13 = vpop.f32.mrf.mxu2 }
 0x101   : > { %v402_v14 = vadd.f32 %v401_v13, %v337_v12  ;;  %v499_v15 = vpop.f32.mrf.mxu3 }
 0x102   : > { %v500_v16 = vadd.f32 %v499_v15, %v337_v12 }
 0x103   : > { %419 = vst [vmem:[%s1130_s5 + $0x78] sm:$0xff] %v402_v14 }
 0x104   : > { %662 = vst [vmem:[%s1130_s5 + $0xf8] sm:$0xff] %v500_v16 }
 0x105   : > { %828 = shalt.err (!%p825_p13)
}
 0x106   : > { %s889_s21 = smov 128   ;;  %s890_s30 = smov 256  }
 0x107   : > { %s891_s4 = smov 8  }
 0x108   : > { %701 = dma.vmem_to_hbm [thread:$0]  (%p963_p9), %s535_s15, 4096, %s537_s9, %s520_s10, %s889_s21, %s890_s30, %s891_s4  }
 0x109 PF: > { %s551_s5 = sand.u32 1, %s863_s12   ;;  %p708_p0 = pnand %p625_p12, %p970_p11 }
 0x10a   : > { %s552_s23 = scalar_lea.sflag [#allocation4], %s551_s5 }
 0x10b   : > { %p709_p1 = pneg %p708_p0 }
 0x10d   : > { %858 = dma.done.wait (%p709_p1), %s552_s23, 4096  }
 0x10e   : > { %860 = vsyncadd (%p709_p1), %s552_s23, 4294963200  ;;  %s19_s17 = sadd.s32 1, %s883_s17   ;;  %s1221_s12 = smov %s867_s13 }
 0x10f   : > { %p16_p2 = scmp.ge.s32.totalorder %s19_s17, 4   ;;  %s1222_s13 = smov %s871_s14 }
 0x110   : > { %s1223_s14 = smov %s968_s26  ;;  %s1224_s15 = smov %s879_s16 }
 0x111   : > { %s1225_s16 = smov %s1227_s20  ;;  %18 = sbr.rel (!%p16_p2) target bundleno = 6 (0x6), region = 79 }
 0x116   :  { %558 = vsyncpa [#allocation3], 1 }
 0x117   :  { %560 = vsyncpa [#allocation3 + $0x1], 1 }
 0x118   :  { %561 = vsyncpa [#allocation4], 1 }
 0x119   :  { %563 = vsyncpa [#allocation4 + $0x1], 1 }

</bundles_post_ra>
